<compile_context>
chip_gen: v5e
topology: v5e:2x2
jax: 0.10.0
libtpu: 0.0.40
codegen_flags: <defaults>
</compile_context>

<pallas_src>
import jax
import jax.numpy as jnp
from jax.experimental import pallas as pl
from jax.experimental.pallas import tpu as pltpu


def _round_up(n, m):
    return ((n + m - 1) // m) * m


def _make_critic_kernel(chunk: int, n_chunks: int):
    """Kernel for one (4, tb) batch tile, batch-on-lanes layout."""

    def kernel(x_ref, w1_ref, b1_ref, w2_ref, b2_ref, o_ref):
        # x_ref : (4, tb)    states (features on sublanes, batch on lanes)
        # w1_ref: (128, 4)   affine1 weight (PyTorch layout), resident
        # b1_ref: (128, 1)   affine1 bias column, resident
        # w2_ref: (1, 128)   value-head weight row, resident
        # b2_ref: (1, 1)     value-head bias, SMEM scalar
        # o_ref : (1, tb)    state values (lane dense)
        w1 = w1_ref[...]                                    # (128, 4)
        w2 = w2_ref[...]                                    # (1, 128) f32
        b2 = b2_ref[0, 0]                                   # scalar   f32
        # Hoist the lane-broadcast of b1 out of the chunk loop (JAX does not
        # CSE broadcast_in_dim; a per-iteration broadcast would burn VPU slots).
        b1 = jnp.broadcast_to(b1_ref[...], (128, chunk))    # (128, chunk) f32

        def body(c, carry):
            off = pl.multiple_of(c * chunk, chunk)
            xs = x_ref[:, pl.ds(off, chunk)]                # (4, chunk)
            # Layer 1 on the MXU, f32 accumulation.
            h = jnp.dot(w1, xs, preferred_element_type=jnp.float32)
            h = jnp.maximum(h + b1, 0.0)                    # (128, chunk) f32
            # Value head (128 -> 1) also on the MXU: full K=128 contraction on
            # an otherwise idle unit; h is consumed while live (never written
            # to a (128, tb) VMEM temp).
            v = jnp.dot(w2, h, preferred_element_type=jnp.float32)  # (1, chunk)
            o_ref[:, pl.ds(off, chunk)] = (v + b2).astype(o_ref.dtype)
            return carry

        jax.lax.fori_loop(0, n_chunks, body, 0,
                          unroll=(n_chunks if n_chunks <= 8 else 8))

    return kernel


def critic_forward(x, w1, b1, w2, b2, *, block_b=65536, input_dtype=jnp.bfloat16):
    """state_values = Linear(128,1)(relu(Linear(4,128)(x)))

    x : (B, 4) float32              (PyTorch (batch, features) layout)
    w1: (128, 4), b1: (128,)        affine1   (PyTorch nn.Linear layout)
    w2: (1, 128), b2: (1,)          value_head
    returns: (B, 1) float32

    input_dtype=bf16 (default) halves the dominant streamed-x HBM traffic with
    f32 accumulation; pass jnp.float32 for a near bit-exact reference match.
    """
    B = x.shape[0]

    # ---- batch tiling: lane-dense tiles, always a multiple of 128 ---------
    block_b = max(128, (int(block_b) // 128) * 128)
    b_lanes = _round_up(B, 128)
    tb = min(block_b, b_lanes)
    # If a single tile would cover the whole batch, split it so both v7x
    # TensorCores get work on the "parallel" axis (no effect on v5e/v6e).
    if tb == b_lanes and b_lanes >= 256:
        tb = _round_up(pl.cdiv(b_lanes, 2), 128)
    num_tiles = pl.cdiv(B, tb)

    # In-kernel chunking of the lane axis (register-friendly sub-slices).
    chunk = 256 if tb % 256 == 0 else 128
    n_chunks = tb // chunk

    # ---- layout plumbing (fuses into one producer pass under jit) ---------
    # Cast BEFORE the transpose so the copy moves the narrow dtype.
    # TODO(synk): upstream producers should emit states batch-minor (4, B) to
    # avoid this transpose pass altogether.
    x_t = jnp.transpose(x.astype(input_dtype))              # (4, B)
    w1_c = w1.astype(input_dtype)                            # (128, 4) resident
    b1_col = b1.reshape(128, 1).astype(jnp.float32)          # (128, 1) resident
    w2_row = w2.reshape(1, 128).astype(jnp.float32)          # (1, 128) resident
    b2_s = b2.reshape(1, 1).astype(jnp.float32)               # (1, 1)  SMEM scalar

    in_bytes = jnp.dtype(input_dtype).itemsize
    cost = pl.CostEstimate(
        flops=int(2 * B * (4 * 128 + 128)),
        transcendentals=0,
        bytes_accessed=int(B * (4 * in_bytes + 4)             # x stream + f32 out
                           + 128 * (4 * in_bytes + 4 + 4) + 4),  # resident params
    )

    out = pl.pallas_call(
        _make_critic_kernel(chunk, n_chunks),
        out_shape=jax.ShapeDtypeStruct((1, B), jnp.float32),
        grid=(num_tiles,),
        in_specs=[
            pl.BlockSpec((4, tb), lambda i: (0, i)),            # x, streamed per tile
            pl.BlockSpec((128, 4), lambda i: (0, 0)),           # w1, resident
            pl.BlockSpec((128, 1), lambda i: (0, 0)),           # b1, resident
            pl.BlockSpec((1, 128), lambda i: (0, 0)),           # w2, resident
            pl.BlockSpec(memory_space=pltpu.MemorySpace.SMEM),  # b2 scalar
        ],
        out_specs=pl.BlockSpec((1, tb), lambda i: (0, i)),
        compiler_params=pltpu.CompilerParams(
            dimension_semantics=("parallel",),                  # megacore-shard batch
        ),
        cost_estimate=cost,
    )(x_t, w1_c, b1_col, w2_row, b2_s)

    # (1, B) -> (B, 1); ragged tails are handled by masked edge blocks in the
    # kernel (no padded HBM copy of x, no slicing needed here).
    return out.reshape(B, 1)


if __name__ == "__main__":
    key = jax.random.PRNGKey(0)
    kx, kx2, kx3, k1, k2, k3, k4 = jax.random.split(key, 7)

    # PyTorch nn.Linear default init: U[-1/sqrt(fan_in), 1/sqrt(fan_in)].
    lim1 = 1.0 / jnp.sqrt(4.0)
    lim2 = 1.0 / jnp.sqrt(128.0)
    w1 = jax.random.uniform(k1, (128, 4), jnp.float32, -lim1, lim1)
    b1 = jax.random.uniform(k2, (128,), jnp.float32, -lim1, lim1)
    w2 = jax.random.uniform(k3, (1, 128), jnp.float32, -lim2, lim2)
    b2 = jax.random.uniform(k4, (1,), jnp.float32, -lim2, lim2)

    def ref_forward(x):
        h = jnp.maximum(x @ w1.T + b1, 0.0)
        return h @ w2.T + b2

    # 1) Small batch (CartPole-style states), f32 streamed path -> tight check.
    x_small = jax.random.normal(kx, (8, 4), jnp.float32)
    out_small = jax.block_until_ready(
        critic_forward(x_small, w1, b1, w2, b2, input_dtype=jnp.float32))
    assert out_small.shape == (8, 1)
    assert jnp.allclose(out_small, ref_forward(x_small), atol=2e-3, rtol=2e-3)

    # 2) Ragged batch, small explicit tile -> 3-step parallel grid with a
    #    masked partial last block; default bf16 streamed path -> loose check.
    x_big = jax.random.normal(kx2, (300, 4), jnp.float32)
    out_big = jax.block_until_ready(
        critic_forward(x_big, w1, b1, w2, b2, block_b=128))
    assert out_big.shape == (300, 1)
    assert jnp.allclose(out_big, ref_forward(x_big), atol=3e-2, rtol=3e-2)

    # 3) Default tiling: exercises the 2-tile megacore split and the inner
    #    multi-chunk loop (tb=512, chunk=256, n_chunks=2).
    x_med = jax.random.normal(kx3, (1024, 4), jnp.float32)
    out_med = jax.block_until_ready(critic_forward(x_med, w1, b1, w2, b2))
    assert out_med.shape == (1024, 1)
    assert jnp.allclose(out_med, ref_forward(x_med), atol=3e-2, rtol=3e-2)

    print("KERNEL_OK")
</pallas_src>

<mosaic_0001>
module attributes {stable_mosaic.version = 11 : i64} {
  func.func @kernel(%arg0: i32, %arg1: memref<4x128xf32, #tpu.memory_space<vmem>>, %arg2: memref<128x4xf32, #tpu.memory_space<vmem>>, %arg3: memref<128x1xf32, #tpu.memory_space<vmem>>, %arg4: memref<1x128xf32, #tpu.memory_space<vmem>>, %arg5: memref<1x1xf32, #tpu.memory_space<smem>>, %arg6: memref<1x128xf32, #tpu.memory_space<vmem>>) attributes {dimension_semantics = [#tpu.dimension_semantics<parallel>], iteration_bounds = array<i64: 1>, scalar_prefetch = 0 : i64, scratch_operands = 0 : i64, tpu.core_type = #tpu.core_type<tc>, window_params = [{transform_indices = @transform_0, window_bounds = array<i64: 4, 128>}, {pipeline_mode = #tpu.pipeline_mode<synchronous>, transform_indices = @transform_1, window_bounds = array<i64: 128, 4>}, {pipeline_mode = #tpu.pipeline_mode<synchronous>, transform_indices = @transform_2, window_bounds = array<i64: 128, 1>}, {pipeline_mode = #tpu.pipeline_mode<synchronous>, transform_indices = @transform_3, window_bounds = array<i64: 1, 128>}, {transform_indices = @transform_4, window_bounds = array<i64: 1, 1>}, {transform_indices = @transform_5, window_bounds = array<i64: 1, 128>}]} {
    %c0 = arith.constant 0 : index
    %c0_0 = arith.constant 0 : index
    %0 = vector.load %arg2[%c0, %c0_0] : memref<128x4xf32, #tpu.memory_space<vmem>>, vector<128x4xf32>
    %c0_1 = arith.constant 0 : index
    %c0_2 = arith.constant 0 : index
    %1 = vector.load %arg4[%c0_1, %c0_2] : memref<1x128xf32, #tpu.memory_space<vmem>>, vector<1x128xf32>
    %c0_3 = arith.constant 0 : index
    %c0_4 = arith.constant 0 : index
    %2 = memref.load %arg5[%c0_3, %c0_4] : memref<1x1xf32, #tpu.memory_space<smem>>
    %c0_5 = arith.constant 0 : index
    %c0_6 = arith.constant 0 : index
    %3 = vector.load %arg3[%c0_5, %c0_6] : memref<128x1xf32, #tpu.memory_space<vmem>>, vector<128x1xf32>
    %4 = vector.shape_cast %3 : vector<128x1xf32> to vector<128x1xf32>
    %5 = vector.broadcast %4 : vector<128x1xf32> to vector<128x128xf32>
    %c0_i32 = arith.constant 0 : i32
    %c128_i32 = arith.constant 128 : i32
    %6 = arith.muli %c0_i32, %c128_i32 : i32
    %7 = tpu.assume_multiple %6, 128 : i32
    %c0_7 = arith.constant 0 : index
    %8 = arith.index_cast %7 : i32 to index
    %9 = vector.load %arg1[%c0_7, %8] : memref<4x128xf32, #tpu.memory_space<vmem>>, vector<4x128xf32>
    %cst = arith.constant dense<0.000000e+00> : vector<128x128xf32>
    %10 = tpu.matmul %0, %9, %cst {dimension_numbers = #tpu.dot_dimension_numbers<[1], [0], [0], [1], [0, 0, 1, 1], [], []>} : vector<128x4xf32>, vector<4x128xf32>, vector<128x128xf32> -> vector<128x128xf32>
    %11 = arith.addf %10, %5 : vector<128x128xf32>
    %cst_8 = arith.constant 0.000000e+00 : f32
    %12 = vector.broadcast %cst_8 : f32 to vector<128x128xf32>
    %13 = arith.maximumf %11, %12 : vector<128x128xf32>
    %cst_9 = arith.constant dense<0.000000e+00> : vector<1x128xf32>
    %14 = tpu.matmul %1, %13, %cst_9 {dimension_numbers = #tpu.dot_dimension_numbers<[1], [0], [0], [1], [0, 0, 1, 1], [], []>} : vector<1x128xf32>, vector<128x128xf32>, vector<1x128xf32> -> vector<1x128xf32>
    %15 = vector.broadcast %2 : f32 to vector<1x128xf32>
    %16 = arith.addf %14, %15 : vector<1x128xf32>
    %c0_10 = arith.constant 0 : index
    %17 = arith.index_cast %7 : i32 to index
    %18 = vector.load %arg6[%c0_10, %17] : memref<1x128xf32, #tpu.memory_space<vmem>>, vector<1x128xf32>
    tpu.vector_store %arg6[%c0_10, %17], %16 {strides = array<i32>} : memref<1x128xf32, #tpu.memory_space<vmem>>, vector<1x128xf32>,
    %c1_i32 = arith.constant 1 : i32
    return
  }
  func.func @transform_0(%arg0: i32) -> (i32, i32) {
    %c0_i32 = arith.constant 0 : i32
    %c0_i32_0 = arith.constant 0 : i32
    return %c0_i32, %arg0 : i32, i32
  }
  func.func @transform_1(%arg0: i32) -> (i32, i32) {
    %c0_i32 = arith.constant 0 : i32
    %c0_i32_0 = arith.constant 0 : i32
    %c0_i32_1 = arith.constant 0 : i32
    return %c0_i32, %c0_i32_0 : i32, i32
  }
  func.func @transform_2(%arg0: i32) -> (i32, i32) {
    %c0_i32 = arith.constant 0 : i32
    %c0_i32_0 = arith.constant 0 : i32
    %c0_i32_1 = arith.constant 0 : i32
    return %c0_i32, %c0_i32_0 : i32, i32
  }
  func.func @transform_3(%arg0: i32) -> (i32, i32) {
    %c0_i32 = arith.constant 0 : i32
    %c0_i32_0 = arith.constant 0 : i32
    %c0_i32_1 = arith.constant 0 : i32
    return %c0_i32, %c0_i32_0 : i32, i32
  }
  func.func @transform_4(%arg0: i32) -> (i32, i32) {
    %c0_i32 = arith.constant 0 : i32
    %c0_i32_0 = arith.constant 0 : i32
    %c0_i32_1 = arith.constant 0 : i32
    return %c0_i32, %c0_i32_0 : i32, i32
  }
  func.func @transform_5(%arg0: i32) -> (i32, i32) {
    %c0_i32 = arith.constant 0 : i32
    %c0_i32_0 = arith.constant 0 : i32
    return %c0_i32, %arg0 : i32, i32
  }
}

</mosaic_0001>

<bundles_post_ra>
// kernel: tpu_custom_call.1
= control target key start
LH: loop header
LB: loop body
LE: loop exit
PB: predicated region body
PF: predicated region fallthrough
CT: control target
= control target key end

     0   :  { %vm186_vm0 = vcmask 1043456   ;;  %vm137_vm1 = vcmask 31744   ;;  %v359_v5 = vmov 0   ;;  %s521_s0 = inlined_call_operand.vmem [shape: f32[4,8], index: 0, kind: input, shape index: {}]   ;;  %s522_s1 = inlined_call_operand.vmem [shape: f32[128,4], index: 1, kind: input, shape index: {}]   ;;  %s523_s2 = inlined_call_operand.vmem [shape: f32[128,1], index: 2, kind: input, shape index: {}]   ;;  %s524_s3 = inlined_call_operand.vmem [shape: f32[1,128], index: 3, kind: input, shape index: {}]   ;;  %s525_s4 = inlined_call_operand.<no memory space> [shape: f32[1,1], index: 4, kind: input, shape index: {}]   ;;  %s526_s5 = inlined_call_operand.hbm [shape: f32[1,8], index: 5, kind: output, shape index: {}]  }
   0x1   :  { %v136_v0 = vld [vmem:[%s521_s0] sm:$0xf]  ;;  %v55_v1 = vld [vmem:[%s523_s2 + $0x78] sm:$0xff]  ;;  %v28_v3 = vld [vmem:[%s522_s1 + $0x30] sm:$0xff]  ;;  %330 = vset.pattern.permute.xlu0 %v359_v5  ;;  %331 = vset.pattern.permute.xlu1 %v359_v5 }
   0x2   :  { %v22_v2 = vld [vmem:[%s522_s1] sm:$0xff]  ;;  %309 = vmatpush.msk.msra.mxu0 %vm186_vm0, %v136_v0  ;;  %326 = vmatpush.msk.msra.mxu2 %vm186_vm0, %v136_v0  ;;  %v53_v6 = vld [vmem:[%s523_s2 + $0x68] sm:$0xff]  ;;  %v51_v7 = vld [vmem:[%s523_s2 + $0x58] sm:$0xff] }
   0x3   :  { %v34_v4 = vld [vmem:[%s522_s1 + $0x60] sm:$0xff]  ;;  %327 = vmatpush.msk.msra.mxu3 %vm186_vm0, %v136_v0  ;;  %133 = vperm.xlu0 %330, %v55_v1   ;;  %v54_v8 = vld [vmem:[%s523_s2 + $0x70] sm:$0xff]  ;;  %v23_v9 = vld [vmem:[%s522_s1 + $0x8] sm:$0xff] }
   0x4   :  { %310 = vmatmul.msk.f32.vlgmr.msra.gmra.mxu0 %vm137_vm1, %v22_v2  ;;  %316 = vmatmul.msk.f32.vlgmr.msra.gmra.mxu2 %vm137_vm1, %v28_v3  ;;  %v29_v10 = vld [vmem:[%s522_s1 + $0x38] sm:$0xff]  ;;  %v35_v11 = vld [vmem:[%s522_s1 + $0x68] sm:$0xff] }
   0x5   :  { %322 = vmatmul.msk.f32.vlgmr.msra.gmra.mxu3 %vm137_vm1, %v34_v4  ;;  %332 = vset.pattern.permute.xlu2 %v359_v5 }
   0x6   :  { %123 = vperm.xlu1 %331, %v53_v6   ;;  %113 = vperm.xlu2 %332, %v51_v7  }
   0x7   :  { %11 = vsyncpa [#allocation4], 0  ;;  %v52_v12 = vld [vmem:[%s523_s2 + $0x60] sm:$0xff]  ;;  %v50_v13 = vld [vmem:[%s523_s2 + $0x50] sm:$0xff]  ;;  %s360_s8 = smov [#allocation3]   ;;  %s300_s12 = sshll.u32 %s526_s5, 4  ;;  %s301_s12 = int_to_ptr.hbm [resolvable:$true] %s300_s12 }
   0x8   :  { %v49_v14 = vld [vmem:[%s523_s2 + $0x48] sm:$0xff]  ;;  %v24_v15 = vld [vmem:[%s522_s1 + $0x10] sm:$0xff]  ;;  %v30_v16 = vld [vmem:[%s522_s1 + $0x40] sm:$0xff]  ;;  %s298_s9 = sshll.u32 %s360_s8, 4  ;;  %s299_s9 = int_to_ptr.vmem [resolvable:$true] %s298_s9 }
   0x9   :  { %v36_v17 = vld [vmem:[%s522_s1 + $0x70] sm:$0xff]  ;;  %v48_v18 = vld [vmem:[%s523_s2 + $0x40] sm:$0xff]  ;;  %v47_v19 = vld [vmem:[%s523_s2 + $0x38] sm:$0xff] }
   0xa   :  { %v46_v20 = vld [vmem:[%s523_s2 + $0x30] sm:$0xff]  ;;  %v25_v21 = vld [vmem:[%s522_s1 + $0x18] sm:$0xff]  ;;  %v31_v22 = vld [vmem:[%s522_s1 + $0x48] sm:$0xff] }
   0xb   :  { %128 = vperm.xlu0 %330, %v54_v8   ;;  %v37_v23 = vld [vmem:[%s522_s1 + $0x78] sm:$0xff]  ;;  %v45_v24 = vld [vmem:[%s523_s2 + $0x28] sm:$0xff]  ;;  %v44_v25 = vld [vmem:[%s523_s2 + $0x20] sm:$0xff] }
   0xc   :  { %311 = vmatmul.msk.f32.gmra.mxu0 %vm137_vm1, %v23_v9  ;;  %317 = vmatmul.msk.f32.gmra.mxu2 %vm137_vm1, %v29_v10  ;;  %v43_v26 = vld [vmem:[%s523_s2 + $0x18] sm:$0xff]  ;;  %v26_v27 = vld [vmem:[%s522_s1 + $0x20] sm:$0xff]  ;;  %v32_v28 = vld [vmem:[%s522_s1 + $0x50] sm:$0xff] }
   0xd   :  { %323 = vmatmul.msk.f32.gmra.mxu3 %vm137_vm1, %v35_v11  ;;  %v42_v29 = vld [vmem:[%s523_s2 + $0x10] sm:$0xff]  ;;  %v41_v30 = vld [vmem:[%s523_s2 + $0x8] sm:$0xff]  ;;  %v40_v31 = vld [vmem:[%s523_s2] sm:$0xff] }
   0xe   :  { %118 = vperm.xlu1 %331, %v52_v12   ;;  %108 = vperm.xlu2 %332, %v50_v13   ;;  %v27_v32 = vld [vmem:[%s522_s1 + $0x28] sm:$0xff]  ;;  %v33_v33 = vld [vmem:[%s522_s1 + $0x58] sm:$0xff] }
  0x13   :  { %103 = vperm.xlu0 %330, %v49_v14  }
  0x14   :  { %312 = vmatmul.msk.f32.gmra.mxu0 %vm137_vm1, %v24_v15  ;;  %318 = vmatmul.msk.f32.gmra.mxu2 %vm137_vm1, %v30_v16 }
  0x15   :  { %324 = vmatmul.msk.f32.gmra.mxu3 %vm137_vm1, %v36_v17 }
  0x16   :  { %98 = vperm.xlu1 %331, %v48_v18   ;;  %93 = vperm.xlu2 %332, %v47_v19  }
  0x1b   :  { %88 = vperm.xlu0 %330, %v46_v20  }
  0x1c   :  { %313 = vmatmul.msk.f32.gmra.mxu0 %vm137_vm1, %v25_v21  ;;  %319 = vmatmul.msk.f32.gmra.mxu2 %vm137_vm1, %v31_v22 }
  0x1d   :  { %325 = vmatmul.msk.f32.gmra.mxu3 %vm137_vm1, %v37_v23 }
  0x1e   :  { %83 = vperm.xlu1 %331, %v45_v24   ;;  %78 = vperm.xlu2 %332, %v44_v25  }
  0x23   :  { %73 = vperm.xlu0 %330, %v43_v26  }
  0x24   :  { %314 = vmatmul.msk.f32.gmra.mxu0 %vm137_vm1, %v26_v27  ;;  %320 = vmatmul.msk.f32.gmra.mxu2 %vm137_vm1, %v32_v28 }
  0x26   :  { %68 = vperm.xlu1 %331, %v42_v29   ;;  %63 = vperm.xlu2 %332, %v41_v30  }
  0x2b   :  { %58 = vperm.xlu0 %330, %v40_v31  }
  0x2c   :  { %315 = vmatmul.msk.f32.gmra.mxu0 %vm137_vm1, %v27_v32  ;;  %321 = vmatmul.msk.f32.gmra.mxu2 %vm137_vm1, %v33_v33 }
  0x60   :  { %v114_v42 = vpop.permute.xlu2 %113 }
  0x68   :  { %v109_v52 = vpop.permute.xlu2 %108 }
  0x70   :  { %v94_v63 = vpop.permute.xlu2 %93 }
  0x75   :  { %v134_v37 = vpop.permute.xlu0 %133 }
  0x78   :  { %v124_v41 = vpop.permute.xlu1 %123  ;;  %v79_v10 = vpop.permute.xlu2 %78 }
  0x7d   :  { %v129_v45 = vpop.permute.xlu0 %128 }
  0x80   :  { %v119_v47 = vpop.permute.xlu1 %118  ;;  %v64_v24 = vpop.permute.xlu2 %63 }
  0x81   :  { %v506_v34 = vpop.f32.mrf.mxu0 }
  0x85   :  { %v104_v55 = vpop.permute.xlu0 %103 }
  0x87   :  { %v225_v35 = vpop.f32.mrf.mxu2 }
  0x88   :  { %v243_v36 = vpop.f32.mrf.mxu3  ;;  %v99_v62 = vpop.permute.xlu1 %98 }
  0x89   :  { %v508_v38 = vpop.f32.mrf.mxu0  ;;  %v244_v57 = vadd.f32 %v243_v36, %v119_v47  ;;  %v271_v36 = vstv %s525_s4 }
  0x8a   :  { %v211_v29 = vadd.f32 %v508_v38, %v64_v24 }
  0x8b   :  { %v267_v61 = vmax.f32 %v244_v57, 0.0 }
  0x8c   :  { %v256_v32 = vmax.f32 %v211_v29, 0.0 }
  0x8d   :  { %v89_v0 = vpop.permute.xlu0 %88 }
  0x8e   :  { %v226_v15 = vadd.f32 %v225_v35, %v89_v0  ;;  %v38_v35 = vld [vmem:[%s524_s3] sm:$0x1] }
  0x8f   :  { %v228_v39 = vpop.f32.mrf.mxu2 }
  0x90   :  { %v246_v40 = vpop.f32.mrf.mxu3  ;;  %v84_v7 = vpop.permute.xlu1 %83  ;;  %v229_v11 = vadd.f32 %v228_v39, %v94_v63  ;;  %v261_v19 = vmax.f32 %v226_v15, 0.0 }
  0x91   :  { %v213_v46 = vpop.f32.mrf.mxu0  ;;  %v247_v53 = vadd.f32 %v246_v40, %v124_v41 }
  0x92   :  { %v262_v17 = vmax.f32 %v229_v11, 0.0 }
  0x93   :  { %v268_v59 = vmax.f32 %v247_v53, 0.0 }
  0x95   :  { %v74_v13 = vpop.permute.xlu0 %73 }
  0x97   :  { %v231_v43 = vpop.f32.mrf.mxu2 }
  0x98   :  { %v249_v44 = vpop.f32.mrf.mxu3  ;;  %v232_v8 = vadd.f32 %v231_v43, %v99_v62  ;;  %v69_v21 = vpop.permute.xlu1 %68 }
  0x99   :  { %v250_v50 = vadd.f32 %v249_v44, %v129_v45  ;;  %v216_v56 = vpop.f32.mrf.mxu0  ;;  %v214_v25 = vadd.f32 %v213_v46, %v69_v21 }
  0x9a   :  { %v263_v16 = vmax.f32 %v232_v8, 0.0  ;;  %v217_v22 = vadd.f32 %v216_v56, %v74_v13 }
  0x9b   :  { %v269_v58 = vmax.f32 %v250_v50, 0.0  ;;  %v257_v31 = vmax.f32 %v214_v25, 0.0 }
  0x9c   :  { %v258_v28 = vmax.f32 %v217_v22, 0.0 }
  0x9d   :  { %v59_v27 = vpop.permute.xlu0 %58 }
  0x9e   :  { %v208_v30 = vadd.f32 %v506_v34, %v59_v27 }
  0x9f   :  { %v234_v48 = vpop.f32.mrf.mxu2 }
  0xa0   :  { %v252_v49 = vpop.f32.mrf.mxu3  ;;  %v235_v5 = vadd.f32 %v234_v48, %v104_v55  ;;  %v255_v33 = vmax.f32 %v208_v30, 0.0 }
  0xa1   :  { %v253_v51 = vadd.f32 %v252_v49, %v134_v37  ;;  %v219_v1 = vpop.f32.mrf.mxu0 }
  0xa2   :  { %v264_v12 = vmax.f32 %v235_v5, 0.0  ;;  %v220_v20 = vadd.f32 %v219_v1, %v79_v10 }
  0xa3   :  { %v270_v54 = vmax.f32 %v253_v51, 0.0 }
  0xa4   :  { %v259_v26 = vmax.f32 %v220_v20, 0.0 }
  0xa5   :  { %272 = vmatpush.msra.mxu1 %v270_v54 }
  0xa7   :  { %273 = vmatpush.msra.mxu1 %v269_v58  ;;  %v237_v60 = vpop.f32.mrf.mxu2 }
  0xa8   :  { %v238_v3 = vadd.f32 %v237_v60, %v109_v52 }
  0xa9   :  { %274 = vmatpush.msra.mxu1 %v268_v59  ;;  %v222_v14 = vpop.f32.mrf.mxu0 }
  0xaa   :  { %v265_v9 = vmax.f32 %v238_v3, 0.0  ;;  %v223_v18 = vadd.f32 %v222_v14, %v84_v7 }
  0xab   :  { %275 = vmatpush.msra.mxu1 %v267_v61 }
  0xac   :  { %v260_v23 = vmax.f32 %v223_v18, 0.0 }
  0xaf   :  { %v240_v2 = vpop.f32.mrf.mxu2 }
  0xb0   :  { %v241_v4 = vadd.f32 %v240_v2, %v114_v42 }
  0xb2   :  { %v266_v6 = vmax.f32 %v241_v4, 0.0 }
  0xb4   :  { %276 = vmatpush.msra.mxu1 %v266_v6 }
  0xb6   :  { %277 = vmatpush.msra.mxu1 %v265_v9 }
  0xb8   :  { %278 = vmatpush.msra.mxu1 %v264_v12 }
  0xba   :  { %279 = vmatpush.msra.mxu1 %v263_v16 }
  0xbc   :  { %280 = vmatpush.msra.mxu1 %v262_v17 }
  0xbe   :  { %281 = vmatpush.msra.mxu1 %v261_v19 }
  0xc0   :  { %282 = vmatpush.msra.mxu1 %v260_v23 }
  0xc2   :  { %283 = vmatpush.msra.mxu1 %v259_v26 }
  0xc4   :  { %284 = vmatpush.msra.mxu1 %v258_v28 }
  0xc6   :  { %285 = vmatpush.msra.mxu1 %v257_v31 }
  0xc8   :  { %286 = vmatpush.msra.mxu1 %v256_v32 }
  0xca   :  { %287 = vmatpush.msra.mxu1 %v255_v33 }
  0xcb   :  { %288 = vmatmul.f32.vlgmr.msra.gmra.mxu1 %v38_v35 }
 0x148   :  { %v289_v34 = vpop.f32.mrf.mxu1 }
 0x149   :  { %v290_v37 = vadd.f32 %v289_v34, %v271_v36 }
 0x14b   :  { %292 = vst [vmem:[#allocation3] sm:$0x1] %v290_v37 }
 0x14c   :  { %303 = dma.vmem_to_hbm [thread:$0]  %s299_s9, 16, %s301_s12, [#allocation4]  }
 0x14d   :  { %357 = dma.done.wait [#allocation4], 16  }
 0x14e   :  { %358 = vsyncadd [#allocation4], 4294967280 }
 0x14f   :  { %308 = vsyncpa [#allocation4], 1 }

</bundles_post_ra>
